<compile_context>
chip_gen: v5e
topology: v5e:2x2
jax: 0.10.0
libtpu: 0.0.40
codegen_flags: <defaults>
</compile_context>

<pallas_src>
import jax
import jax.numpy as jnp
from jax import lax
from jax.experimental import pallas as pl
from jax.experimental.pallas import tpu as pltpu


# ----------------------------------------------------------------------------
# Pallas kernel: 3x3 'same' conv + bias + ReLU for one batch element,
# activation layout (C, H*W)  (channels on sublanes, flattened spatial on lanes).
# ----------------------------------------------------------------------------
def _make_conv3x3_relu_kernel(H, W, Cin, Cout):
    HW = H * W
    PAD = W + 1  # zero margin on each side of the flat image covers every tap shift

    def kernel(x_ref, w_ref, b_ref, o_ref, pad_ref, col_ref):
        # x_ref : (1, Cin, HW)        flattened NCHW activation for this batch index
        # w_ref : (Cout, 9*Cin)       weights, (ky, kx, ci) flattened on the K dim
        # b_ref : (Cout, 1)           bias
        # o_ref : (1, Cout, HW)       flattened NCHW output
        # pad_ref: (Cin, HW + 2*PAD)  VMEM scratch: zero-extended image ('same' padding)
        # col_ref: (9*Cin, HW)        VMEM scratch: im2col operand for one MXU matmul

        # In-kernel zero padding (replaces a full-tensor HBM jnp.pad pass per layer).
        pad_ref[...] = jnp.zeros_like(pad_ref)
        pad_ref[:, PAD:PAD + HW] = x_ref[0]

        # Column index of every flattened pixel: horizontal taps wrap across rows in
        # the flat layout, so dx=-1 must be zeroed at x==0 and dx=+1 at x==W-1.
        col_idx = lax.broadcasted_iota(jnp.int32, (Cin, HW), 1) % W
        not_left = col_idx > 0
        not_right = col_idx < (W - 1)

        # Build the (9*Cin, HW) im2col operand: tap (ky, kx) is a static lane-shifted
        # slice of the zero-extended image (shift = (ky-1)*W + (kx-1)); the vertical
        # boundary is handled automatically by the zero margins.
        for ky in range(3):
            for kx in range(3):
                off = PAD + (ky - 1) * W + (kx - 1)
                tap = pad_ref[:, off:off + HW]
                if kx == 0:
                    tap = jnp.where(not_left, tap, 0.0)
                elif kx == 2:
                    tap = jnp.where(not_right, tap, 0.0)
                t = ky * 3 + kx
                col_ref[t * Cin:(t + 1) * Cin, :] = tap

        # Single MXU matmul with K = 9*Cin (instead of 9 tiny K=Cin matmuls), f32
        # accumulate, lane-dense (Cout, HW) result; bias + ReLU fused (Block.forward).
        acc = jnp.dot(w_ref[...], col_ref[...], preferred_element_type=jnp.float32)
        acc = acc + b_ref[...]
        acc = jnp.maximum(acc, 0.0)
        o_ref[...] = acc.reshape(1, Cout, HW).astype(o_ref.dtype)

    return kernel


def conv3x3_relu(x_nchw, w_flat, bias):
    """Block.forward: relu(conv2d(x, 3x3, padding='same')); NCHW in / NCHW out."""
    N, Cin, H, W = x_nchw.shape
    Cout = w_flat.shape[0]
    HW = H * W

    x_flat = x_nchw.reshape(N, Cin, HW)   # free contiguous reshape (no transpose, no pad)
    b2 = bias.reshape(Cout, 1)

    kernel = _make_conv3x3_relu_kernel(H, W, Cin, Cout)
    cost = pl.CostEstimate(
        flops=2 * N * HW * 9 * Cin * Cout,
        transcendentals=0,
        bytes_accessed=4 * (N * Cin * HW + N * Cout * HW + Cout * 9 * Cin + Cout),
    )

    out_flat = pl.pallas_call(
        kernel,
        out_shape=jax.ShapeDtypeStruct((N, Cout, HW), x_nchw.dtype),
        grid_spec=pltpu.PrefetchScalarGridSpec(
            num_scalar_prefetch=0,
            grid=(N,),  # batch axis, marked parallel (megacore on multi-TC parts)
            in_specs=[
                pl.BlockSpec((1, Cin, HW), lambda n: (n, 0, 0)),
                pl.BlockSpec((Cout, 9 * Cin), lambda n: (0, 0)),
                pl.BlockSpec((Cout, 1), lambda n: (0, 0)),
            ],
            out_specs=pl.BlockSpec((1, Cout, HW), lambda n: (n, 0, 0)),
            scratch_shapes=[
                pltpu.VMEM((Cin, HW + 2 * (W + 1)), x_nchw.dtype),  # padded flat image
                pltpu.VMEM((9 * Cin, HW), x_nchw.dtype),            # im2col operand
            ],
        ),
        compiler_params=pltpu.CompilerParams(
            dimension_semantics=("parallel",),
            # Explicit VMEM budget; safe on all current generations at these block sizes.
            # For large decoder resolutions, add an H-tiled grid axis (with a 1-row halo)
            # and re-derive this budget for v7x's 64 MiB VMEM.
            vmem_limit_bytes=64 * 1024 * 1024,
        ),
        cost_estimate=cost,
    )(x_flat, w_flat, b2)

    return out_flat.reshape(N, Cout, H, W)   # free reshape back to NCHW


def upsample_nearest_2x(x_nchw):
    # nn.Upsample(scale_factor=2, mode='nearest'); pure data replication, kept as XLA
    # glue (fusing the column interleave into the conv kernel's store is future work).
    x = jnp.repeat(x_nchw, 2, axis=2)
    return jnp.repeat(x, 2, axis=3)


# ----------------------------------------------------------------------------
# Decoder parameters (deterministic init, PyTorch Conv2d-style uniform bounds).
# Weights are pre-flattened to (Cout, 9*Cin) with (ky, kx, ci) ordering once at init,
# matching the kernel's im2col row order -> no per-layer weight shuffling at runtime.
# ----------------------------------------------------------------------------
def init_decoder_params(key, channels, skip):
    chans = [channels[0]] + list(channels)
    params = []
    for i in range(len(chans) - 1):
        in_c = chans[i] * (2 if i != 0 and skip else 1)
        out_c = chans[i + 1]
        key, kw, kb = jax.random.split(key, 3)
        bound = 1.0 / jnp.sqrt(in_c * 9.0)
        w_oihw = jax.random.uniform(kw, (out_c, in_c, 3, 3), jnp.float32, -bound, bound)
        b = jax.random.uniform(kb, (out_c,), jnp.float32, -bound, bound)
        w_flat = jnp.transpose(w_oihw, (0, 2, 3, 1)).reshape(out_c, 9 * in_c)
        params.append((w_flat, b))
    return params


def decoder_forward(x, skips, params, skip):
    """Mirror of Decoder.forward(x, o)."""
    if not skip:
        skips = [None] * len(params)
    for (w, b), z in zip(params, skips):
        x = conv3x3_relu(x, w, b)       # Block: conv3x3 'same' + bias + ReLU  (Pallas)
        x = upsample_nearest_2x(x)      # nearest 2x upsample                  (XLA glue)
        if skip:
            x = jnp.concatenate([x, z], axis=1)   # torch.cat(dim=1)           (XLA glue)
    return x


# ----------------------------------------------------------------------------
# Pure-JAX reference (for correctness check of the Pallas conv)
# ----------------------------------------------------------------------------
def _conv_ref(x_nchw, w_flat, b):
    out_c = w_flat.shape[0]
    in_c = w_flat.shape[1] // 9
    w_oihw = jnp.transpose(w_flat.reshape(out_c, 3, 3, in_c), (0, 3, 1, 2))
    y = lax.conv_general_dilated(x_nchw, w_oihw, (1, 1), "SAME",
                                 dimension_numbers=("NCHW", "OIHW", "NCHW"))
    return jnp.maximum(y + b[None, :, None, None], 0.0)


if __name__ == "__main__":
    key = jax.random.PRNGKey(0)
    channels = [4, 8]          # Decoder(channels=[4, 8], skip=True)
    skip = True
    N, H, W = 2, 8, 8

    k1, k2, k3, kp = jax.random.split(key, 4)
    x = jax.random.normal(k1, (N, channels[0], H, W), jnp.float32)
    # skip connections: must match channel count / spatial size after each upsample
    z0 = jax.random.normal(k2, (N, channels[0], 2 * H, 2 * W), jnp.float32)
    z1 = jax.random.normal(k3, (N, channels[1], 4 * H, 4 * W), jnp.float32)
    skips = [z0, z1]

    params = init_decoder_params(kp, channels, skip)

    fwd = jax.jit(decoder_forward, static_argnames=("skip",))
    out = fwd(x, skips, params, skip=skip)
    out = jax.block_until_ready(out)

    # reference check
    xr = x
    for (w, b), z in zip(params, skips):
        xr = _conv_ref(xr, w, b)
        xr = upsample_nearest_2x(xr)
        if skip:
            xr = jnp.concatenate([xr, z], axis=1)

    assert out.shape == (N, 2 * channels[-1], 4 * H, 4 * W), out.shape
    assert jnp.allclose(out, xr, atol=1e-4, rtol=1e-4), float(jnp.max(jnp.abs(out - xr)))
    print("KERNEL_OK")
</pallas_src>

<mosaic_0001>
module attributes {stable_mosaic.version = 11 : i64} {
  func.func @kernel(%arg0: i32, %arg1: memref<1x4x64xf32, #tpu.memory_space<vmem>>, %arg2: memref<4x36xf32, #tpu.memory_space<vmem>>, %arg3: memref<4x1xf32, #tpu.memory_space<vmem>>, %arg4: memref<1x4x64xf32, #tpu.memory_space<vmem>>, %arg5: memref<4x82xf32, #tpu.memory_space<vmem>>, %arg6: memref<36x64xf32, #tpu.memory_space<vmem>>) attributes {dimension_semantics = [#tpu.dimension_semantics<parallel>], iteration_bounds = array<i64: 2>, scalar_prefetch = 0 : i64, scratch_operands = 2 : i64, tpu.core_type = #tpu.core_type<tc>, window_params = [{transform_indices = @transform_0, window_bounds = array<i64: 1, 4, 64>}, {pipeline_mode = #tpu.pipeline_mode<synchronous>, transform_indices = @transform_1, window_bounds = array<i64: 4, 36>}, {pipeline_mode = #tpu.pipeline_mode<synchronous>, transform_indices = @transform_2, window_bounds = array<i64: 4, 1>}, {transform_indices = @transform_3, window_bounds = array<i64: 1, 4, 64>}]} {
    %cst = arith.constant 0.000000e+00 : f32
    %0 = vector.broadcast %cst : f32 to vector<4x82xf32>
    %c0 = arith.constant 0 : index
    %c0_0 = arith.constant 0 : index
    %1 = vector.load %arg5[%c0, %c0_0] : memref<4x82xf32, #tpu.memory_space<vmem>>, vector<4x82xf32>
    tpu.vector_store %arg5[%c0, %c0_0], %0 {strides = array<i32>} : memref<4x82xf32, #tpu.memory_space<vmem>>, vector<4x82xf32>,
    %c0_1 = arith.constant 0 : index
    %c0_2 = arith.constant 0 : index
    %c0_3 = arith.constant 0 : index
    %2 = vector.load %arg1[%c0_1, %c0_2, %c0_3] : memref<1x4x64xf32, #tpu.memory_space<vmem>>, vector<1x4x64xf32>
    %3 = vector.shape_cast %2 : vector<1x4x64xf32> to vector<4x64xf32>
    %c0_4 = arith.constant 0 : index
    %c9 = arith.constant 9 : index
    %4 = vector.load %arg5[%c0_4, %c9] : memref<4x82xf32, #tpu.memory_space<vmem>>, vector<4x64xf32>
    tpu.vector_store %arg5[%c0_4, %c9], %3 {strides = array<i32>} : memref<4x82xf32, #tpu.memory_space<vmem>>, vector<4x64xf32>,
    %5 = tpu.iota {dimensions = array<i32: 1>} : vector<4x64xi32>
    %c8_i32 = arith.constant 8 : i32
    %c0_i32 = arith.constant 0 : i32
    %6 = arith.cmpi eq, %c8_i32, %c0_i32 : i32
    %c1_i32 = arith.constant 1 : i32
    %7 = arith.select %6, %c1_i32, %c8_i32 : i32
    %8 = vector.broadcast %7 : i32 to vector<4x64xi32>
    %9 = arith.remsi %5, %8 : vector<4x64xi32>
    %c0_i32_5 = arith.constant 0 : i32
    %10 = vector.broadcast %c0_i32_5 : i32 to vector<4x64xi32>
    %11 = arith.cmpi ne, %9, %10 : vector<4x64xi32>
    %c0_i32_6 = arith.constant 0 : i32
    %12 = vector.broadcast %c0_i32_6 : i32 to vector<4x64xi32>
    %13 = arith.cmpi slt, %9, %12 : vector<4x64xi32>
    %c0_i32_7 = arith.constant 0 : i32
    %14 = arith.cmpi slt, %7, %c0_i32_7 : i32
    %15 = vector.broadcast %14 : i1 to vector<4x64xi1>
    %16 = vector.broadcast %15 : vector<4x64xi1> to vector<4x64xi1>
    %17 = arith.xori %13, %16 : vector<4x64xi1>
    %18 = arith.andi %17, %11 : vector<4x64xi1>
    %19 = vector.broadcast %7 : i32 to vector<4x64xi32>
    %20 = arith.addi %9, %19 : vector<4x64xi32>
    %21 = arith.select %18, %20, %9 : vector<4x64xi1>, vector<4x64xi32>
    %c0_i32_8 = arith.constant 0 : i32
    %22 = vector.broadcast %c0_i32_8 : i32 to vector<4x64xi32>
    %23 = arith.cmpi sgt, %21, %22 : vector<4x64xi32>
    %c7_i32 = arith.constant 7 : i32
    %24 = vector.broadcast %c7_i32 : i32 to vector<4x64xi32>
    %25 = arith.cmpi slt, %21, %24 : vector<4x64xi32>
    %c0_9 = arith.constant 0 : index
    %c0_10 = arith.constant 0 : index
    %26 = vector.load %arg5[%c0_9, %c0_10] : memref<4x82xf32, #tpu.memory_space<vmem>>, vector<4x64xf32>
    %cst_11 = arith.constant 0.000000e+00 : f32
    %27 = vector.broadcast %cst_11 : f32 to vector<4x64xf32>
    %28 = arith.select %23, %26, %27 : vector<4x64xi1>, vector<4x64xf32>
    %c0_12 = arith.constant 0 : index
    %c0_13 = arith.constant 0 : index
    %29 = vector.load %arg6[%c0_12, %c0_13] : memref<36x64xf32, #tpu.memory_space<vmem>>, vector<4x64xf32>
    tpu.vector_store %arg6[%c0_12, %c0_13], %28 {strides = array<i32>} : memref<36x64xf32, #tpu.memory_space<vmem>>, vector<4x64xf32>,
    %c0_14 = arith.constant 0 : index
    %c1 = arith.constant 1 : index
    %30 = vector.load %arg5[%c0_14, %c1] : memref<4x82xf32, #tpu.memory_space<vmem>>, vector<4x64xf32>
    %c4 = arith.constant 4 : index
    %c0_15 = arith.constant 0 : index
    %31 = vector.load %arg6[%c4, %c0_15] : memref<36x64xf32, #tpu.memory_space<vmem>>, vector<4x64xf32>
    tpu.vector_store %arg6[%c4, %c0_15], %30 {strides = array<i32>} : memref<36x64xf32, #tpu.memory_space<vmem>>, vector<4x64xf32>,
    %c0_16 = arith.constant 0 : index
    %c2 = arith.constant 2 : index
    %32 = vector.load %arg5[%c0_16, %c2] : memref<4x82xf32, #tpu.memory_space<vmem>>, vector<4x64xf32>
    %cst_17 = arith.constant 0.000000e+00 : f32
    %33 = vector.broadcast %cst_17 : f32 to vector<4x64xf32>
    %34 = arith.select %25, %32, %33 : vector<4x64xi1>, vector<4x64xf32>
    %c8 = arith.constant 8 : index
    %c0_18 = arith.constant 0 : index
    %35 = vector.load %arg6[%c8, %c0_18] : memref<36x64xf32, #tpu.memory_space<vmem>>, vector<4x64xf32>
    tpu.vector_store %arg6[%c8, %c0_18], %34 {strides = array<i32>} : memref<36x64xf32, #tpu.memory_space<vmem>>, vector<4x64xf32>,
    %c0_19 = arith.constant 0 : index
    %c8_20 = arith.constant 8 : index
    %36 = vector.load %arg5[%c0_19, %c8_20] : memref<4x82xf32, #tpu.memory_space<vmem>>, vector<4x64xf32>
    %cst_21 = arith.constant 0.000000e+00 : f32
    %37 = vector.broadcast %cst_21 : f32 to vector<4x64xf32>
    %38 = arith.select %23, %36, %37 : vector<4x64xi1>, vector<4x64xf32>
    %c12 = arith.constant 12 : index
    %c0_22 = arith.constant 0 : index
    %39 = vector.load %arg6[%c12, %c0_22] : memref<36x64xf32, #tpu.memory_space<vmem>>, vector<4x64xf32>
    tpu.vector_store %arg6[%c12, %c0_22], %38 {strides = array<i32>} : memref<36x64xf32, #tpu.memory_space<vmem>>, vector<4x64xf32>,
    %c0_23 = arith.constant 0 : index
    %c9_24 = arith.constant 9 : index
    %40 = vector.load %arg5[%c0_23, %c9_24] : memref<4x82xf32, #tpu.memory_space<vmem>>, vector<4x64xf32>
    %c16 = arith.constant 16 : index
    %c0_25 = arith.constant 0 : index
    %41 = vector.load %arg6[%c16, %c0_25] : memref<36x64xf32, #tpu.memory_space<vmem>>, vector<4x64xf32>
    tpu.vector_store %arg6[%c16, %c0_25], %40 {strides = array<i32>} : memref<36x64xf32, #tpu.memory_space<vmem>>, vector<4x64xf32>,
    %c0_26 = arith.constant 0 : index
    %c10 = arith.constant 10 : index
    %42 = vector.load %arg5[%c0_26, %c10] : memref<4x82xf32, #tpu.memory_space<vmem>>, vector<4x64xf32>
    %cst_27 = arith.constant 0.000000e+00 : f32
    %43 = vector.broadcast %cst_27 : f32 to vector<4x64xf32>
    %44 = arith.select %25, %42, %43 : vector<4x64xi1>, vector<4x64xf32>
    %c20 = arith.constant 20 : index
    %c0_28 = arith.constant 0 : index
    %45 = vector.load %arg6[%c20, %c0_28] : memref<36x64xf32, #tpu.memory_space<vmem>>, vector<4x64xf32>
    tpu.vector_store %arg6[%c20, %c0_28], %44 {strides = array<i32>} : memref<36x64xf32, #tpu.memory_space<vmem>>, vector<4x64xf32>,
    %c0_29 = arith.constant 0 : index
    %c16_30 = arith.constant 16 : index
    %46 = vector.load %arg5[%c0_29, %c16_30] : memref<4x82xf32, #tpu.memory_space<vmem>>, vector<4x64xf32>
    %cst_31 = arith.constant 0.000000e+00 : f32
    %47 = vector.broadcast %cst_31 : f32 to vector<4x64xf32>
    %48 = arith.select %23, %46, %47 : vector<4x64xi1>, vector<4x64xf32>
    %c24 = arith.constant 24 : index
    %c0_32 = arith.constant 0 : index
    %49 = vector.load %arg6[%c24, %c0_32] : memref<36x64xf32, #tpu.memory_space<vmem>>, vector<4x64xf32>
    tpu.vector_store %arg6[%c24, %c0_32], %48 {strides = array<i32>} : memref<36x64xf32, #tpu.memory_space<vmem>>, vector<4x64xf32>,
    %c0_33 = arith.constant 0 : index
    %c17 = arith.constant 17 : index
    %50 = vector.load %arg5[%c0_33, %c17] : memref<4x82xf32, #tpu.memory_space<vmem>>, vector<4x64xf32>
    %c28 = arith.constant 28 : index
    %c0_34 = arith.constant 0 : index
    %51 = vector.load %arg6[%c28, %c0_34] : memref<36x64xf32, #tpu.memory_space<vmem>>, vector<4x64xf32>
    tpu.vector_store %arg6[%c28, %c0_34], %50 {strides = array<i32>} : memref<36x64xf32, #tpu.memory_space<vmem>>, vector<4x64xf32>,
    %c0_35 = arith.constant 0 : index
    %c18 = arith.constant 18 : index
    %52 = vector.load %arg5[%c0_35, %c18] : memref<4x82xf32, #tpu.memory_space<vmem>>, vector<4x64xf32>
    %cst_36 = arith.constant 0.000000e+00 : f32
    %53 = vector.broadcast %cst_36 : f32 to vector<4x64xf32>
    %54 = arith.select %25, %52, %53 : vector<4x64xi1>, vector<4x64xf32>
    %c32 = arith.constant 32 : index
    %c0_37 = arith.constant 0 : index
    %55 = vector.load %arg6[%c32, %c0_37] : memref<36x64xf32, #tpu.memory_space<vmem>>, vector<4x64xf32>
    tpu.vector_store %arg6[%c32, %c0_37], %54 {strides = array<i32>} : memref<36x64xf32, #tpu.memory_space<vmem>>, vector<4x64xf32>,
    %c0_38 = arith.constant 0 : index
    %c0_39 = arith.constant 0 : index
    %56 = vector.load %arg2[%c0_38, %c0_39] : memref<4x36xf32, #tpu.memory_space<vmem>>, vector<4x36xf32>
    %c0_40 = arith.constant 0 : index
    %c0_41 = arith.constant 0 : index
    %57 = vector.load %arg6[%c0_40, %c0_41] : memref<36x64xf32, #tpu.memory_space<vmem>>, vector<36x64xf32>
    %cst_42 = arith.constant dense<0.000000e+00> : vector<4x64xf32>
    %58 = tpu.matmul %56, %57, %cst_42 {dimension_numbers = #tpu.dot_dimension_numbers<[1], [0], [0], [1], [0, 0, 1, 1], [], []>} : vector<4x36xf32>, vector<36x64xf32>, vector<4x64xf32> -> vector<4x64xf32>
    %c0_43 = arith.constant 0 : index
    %c0_44 = arith.constant 0 : index
    %59 = vector.load %arg3[%c0_43, %c0_44] : memref<4x1xf32, #tpu.memory_space<vmem>>, vector<4x1xf32>
    %60 = vector.broadcast %59 : vector<4x1xf32> to vector<4x64xf32>
    %61 = arith.addf %58, %60 : vector<4x64xf32>
    %cst_45 = arith.constant 0.000000e+00 : f32
    %62 = vector.broadcast %cst_45 : f32 to vector<4x64xf32>
    %63 = arith.maximumf %61, %62 : vector<4x64xf32>
    %64 = vector.shape_cast %63 : vector<4x64xf32> to vector<1x4x64xf32>
    %c0_46 = arith.constant 0 : index
    %c0_47 = arith.constant 0 : index
    %c0_48 = arith.constant 0 : index
    %65 = vector.load %arg4[%c0_46, %c0_47, %c0_48] : memref<1x4x64xf32, #tpu.memory_space<vmem>>, vector<1x4x64xf32>
    tpu.vector_store %arg4[%c0_46, %c0_47, %c0_48], %64 {strides = array<i32>} : memref<1x4x64xf32, #tpu.memory_space<vmem>>, vector<1x4x64xf32>,
    return
  }
  func.func @transform_0(%arg0: i32) -> (i32, i32, i32) {
    %c0_i32 = arith.constant 0 : i32
    %c0_i32_0 = arith.constant 0 : i32
    %c0_i32_1 = arith.constant 0 : i32
    return %arg0, %c0_i32, %c0_i32_0 : i32, i32, i32
  }
  func.func @transform_1(%arg0: i32) -> (i32, i32) {
    %c0_i32 = arith.constant 0 : i32
    %c0_i32_0 = arith.constant 0 : i32
    %c0_i32_1 = arith.constant 0 : i32
    return %c0_i32, %c0_i32_0 : i32, i32
  }
  func.func @transform_2(%arg0: i32) -> (i32, i32) {
    %c0_i32 = arith.constant 0 : i32
    %c0_i32_0 = arith.constant 0 : i32
    %c0_i32_1 = arith.constant 0 : i32
    return %c0_i32, %c0_i32_0 : i32, i32
  }
  func.func @transform_3(%arg0: i32) -> (i32, i32, i32) {
    %c0_i32 = arith.constant 0 : i32
    %c0_i32_0 = arith.constant 0 : i32
    %c0_i32_1 = arith.constant 0 : i32
    return %arg0, %c0_i32, %c0_i32_0 : i32, i32, i32
  }
}

module attributes {stable_mosaic.version = 11 : i64} {
  func.func @kernel(%arg0: i32, %arg1: memref<1x8x256xf32, #tpu.memory_space<vmem>>, %arg2: memref<8x72xf32, #tpu.memory_space<vmem>>, %arg3: memref<8x1xf32, #tpu.memory_space<vmem>>, %arg4: memref<1x8x256xf32, #tpu.memory_space<vmem>>, %arg5: memref<8x290xf32, #tpu.memory_space<vmem>>, %arg6: memref<72x256xf32, #tpu.memory_space<vmem>>) attributes {dimension_semantics = [#tpu.dimension_semantics<parallel>], iteration_bounds = array<i64: 2>, scalar_prefetch = 0 : i64, scratch_operands = 2 : i64, tpu.core_type = #tpu.core_type<tc>, window_params = [{transform_indices = @transform_0, window_bounds = array<i64: 1, 8, 256>}, {pipeline_mode = #tpu.pipeline_mode<synchronous>, transform_indices = @transform_1, window_bounds = array<i64: 8, 72>}, {pipeline_mode = #tpu.pipeline_mode<synchronous>, transform_indices = @transform_2, window_bounds = array<i64: 8, 1>}, {transform_indices = @transform_3, window_bounds = array<i64: 1, 8, 256>}]} {
    %cst = arith.constant 0.000000e+00 : f32
    %0 = vector.broadcast %cst : f32 to vector<8x290xf32>
    %c0 = arith.constant 0 : index
    %c0_0 = arith.constant 0 : index
    %1 = vector.load %arg5[%c0, %c0_0] : memref<8x290xf32, #tpu.memory_space<vmem>>, vector<8x290xf32>
    tpu.vector_store %arg5[%c0, %c0_0], %0 {strides = array<i32>} : memref<8x290xf32, #tpu.memory_space<vmem>>, vector<8x290xf32>,
    %c0_1 = arith.constant 0 : index
    %c0_2 = arith.constant 0 : index
    %c0_3 = arith.constant 0 : index
    %2 = vector.load %arg1[%c0_1, %c0_2, %c0_3] : memref<1x8x256xf32, #tpu.memory_space<vmem>>, vector<1x8x256xf32>
    %3 = vector.shape_cast %2 : vector<1x8x256xf32> to vector<8x256xf32>
    %c0_4 = arith.constant 0 : index
    %c17 = arith.constant 17 : index
    %4 = vector.load %arg5[%c0_4, %c17] : memref<8x290xf32, #tpu.memory_space<vmem>>, vector<8x256xf32>
    tpu.vector_store %arg5[%c0_4, %c17], %3 {strides = array<i32>} : memref<8x290xf32, #tpu.memory_space<vmem>>, vector<8x256xf32>,
    %5 = tpu.iota {dimensions = array<i32: 1>} : vector<8x256xi32>
    %c16_i32 = arith.constant 16 : i32
    %c0_i32 = arith.constant 0 : i32
    %6 = arith.cmpi eq, %c16_i32, %c0_i32 : i32
    %c1_i32 = arith.constant 1 : i32
    %7 = arith.select %6, %c1_i32, %c16_i32 : i32
    %8 = vector.broadcast %7 : i32 to vector<8x256xi32>
    %9 = arith.remsi %5, %8 : vector<8x256xi32>
    %c0_i32_5 = arith.constant 0 : i32
    %10 = vector.broadcast %c0_i32_5 : i32 to vector<8x256xi32>
    %11 = arith.cmpi ne, %9, %10 : vector<8x256xi32>
    %c0_i32_6 = arith.constant 0 : i32
    %12 = vector.broadcast %c0_i32_6 : i32 to vector<8x256xi32>
    %13 = arith.cmpi slt, %9, %12 : vector<8x256xi32>
    %c0_i32_7 = arith.constant 0 : i32
    %14 = arith.cmpi slt, %7, %c0_i32_7 : i32
    %15 = vector.broadcast %14 : i1 to vector<8x256xi1>
    %16 = vector.broadcast %15 : vector<8x256xi1> to vector<8x256xi1>
    %17 = arith.xori %13, %16 : vector<8x256xi1>
    %18 = arith.andi %17, %11 : vector<8x256xi1>
    %19 = vector.broadcast %7 : i32 to vector<8x256xi32>
    %20 = arith.addi %9, %19 : vector<8x256xi32>
    %21 = arith.select %18, %20, %9 : vector<8x256xi1>, vector<8x256xi32>
    %c0_i32_8 = arith.constant 0 : i32
    %22 = vector.broadcast %c0_i32_8 : i32 to vector<8x256xi32>
    %23 = arith.cmpi sgt, %21, %22 : vector<8x256xi32>
    %c15_i32 = arith.constant 15 : i32
    %24 = vector.broadcast %c15_i32 : i32 to vector<8x256xi32>
    %25 = arith.cmpi slt, %21, %24 : vector<8x256xi32>
    %c0_9 = arith.constant 0 : index
    %c0_10 = arith.constant 0 : index
    %26 = vector.load %arg5[%c0_9, %c0_10] : memref<8x290xf32, #tpu.memory_space<vmem>>, vector<8x256xf32>
    %cst_11 = arith.constant 0.000000e+00 : f32
    %27 = vector.broadcast %cst_11 : f32 to vector<8x256xf32>
    %28 = arith.select %23, %26, %27 : vector<8x256xi1>, vector<8x256xf32>
    %c0_12 = arith.constant 0 : index
    %c0_13 = arith.constant 0 : index
    %29 = vector.load %arg6[%c0_12, %c0_13] : memref<72x256xf32, #tpu.memory_space<vmem>>, vector<8x256xf32>
    tpu.vector_store %arg6[%c0_12, %c0_13], %28 {strides = array<i32>} : memref<72x256xf32, #tpu.memory_space<vmem>>, vector<8x256xf32>,
    %c0_14 = arith.constant 0 : index
    %c1 = arith.constant 1 : index
    %30 = vector.load %arg5[%c0_14, %c1] : memref<8x290xf32, #tpu.memory_space<vmem>>, vector<8x256xf32>
    %c8 = arith.constant 8 : index
    %c0_15 = arith.constant 0 : index
    %31 = vector.load %arg6[%c8, %c0_15] : memref<72x256xf32, #tpu.memory_space<vmem>>, vector<8x256xf32>
    tpu.vector_store %arg6[%c8, %c0_15], %30 {strides = array<i32>} : memref<72x256xf32, #tpu.memory_space<vmem>>, vector<8x256xf32>,
    %c0_16 = arith.constant 0 : index
    %c2 = arith.constant 2 : index
    %32 = vector.load %arg5[%c0_16, %c2] : memref<8x290xf32, #tpu.memory_space<vmem>>, vector<8x256xf32>
    %cst_17 = arith.constant 0.000000e+00 : f32
    %33 = vector.broadcast %cst_17 : f32 to vector<8x256xf32>
    %34 = arith.select %25, %32, %33 : vector<8x256xi1>, vector<8x256xf32>
    %c16 = arith.constant 16 : index
    %c0_18 = arith.constant 0 : index
    %35 = vector.load %arg6[%c16, %c0_18] : memref<72x256xf32, #tpu.memory_space<vmem>>, vector<8x256xf32>
    tpu.vector_store %arg6[%c16, %c0_18], %34 {strides = array<i32>} : memref<72x256xf32, #tpu.memory_space<vmem>>, vector<8x256xf32>,
    %c0_19 = arith.constant 0 : index
    %c16_20 = arith.constant 16 : index
    %36 = vector.load %arg5[%c0_19, %c16_20] : memref<8x290xf32, #tpu.memory_space<vmem>>, vector<8x256xf32>
    %cst_21 = arith.constant 0.000000e+00 : f32
    %37 = vector.broadcast %cst_21 : f32 to vector<8x256xf32>
    %38 = arith.select %23, %36, %37 : vector<8x256xi1>, vector<8x256xf32>
    %c24 = arith.constant 24 : index
    %c0_22 = arith.constant 0 : index
    %39 = vector.load %arg6[%c24, %c0_22] : memref<72x256xf32, #tpu.memory_space<vmem>>, vector<8x256xf32>
    tpu.vector_store %arg6[%c24, %c0_22], %38 {strides = array<i32>} : memref<72x256xf32, #tpu.memory_space<vmem>>, vector<8x256xf32>,
    %c0_23 = arith.constant 0 : index
    %c17_24 = arith.constant 17 : index
    %40 = vector.load %arg5[%c0_23, %c17_24] : memref<8x290xf32, #tpu.memory_space<vmem>>, vector<8x256xf32>
    %c32 = arith.constant 32 : index
    %c0_25 = arith.constant 0 : index
    %41 = vector.load %arg6[%c32, %c0_25] : memref<72x256xf32, #tpu.memory_space<vmem>>, vector<8x256xf32>
    tpu.vector_store %arg6[%c32, %c0_25], %40 {strides = array<i32>} : memref<72x256xf32, #tpu.memory_space<vmem>>, vector<8x256xf32>,
    %c0_26 = arith.constant 0 : index
    %c18 = arith.constant 18 : index
    %42 = vector.load %arg5[%c0_26, %c18] : memref<8x290xf32, #tpu.memory_space<vmem>>, vector<8x256xf32>
    %cst_27 = arith.constant 0.000000e+00 : f32
    %43 = vector.broadcast %cst_27 : f32 to vector<8x256xf32>
    %44 = arith.select %25, %42, %43 : vector<8x256xi1>, vector<8x256xf32>
    %c40 = arith.constant 40 : index
    %c0_28 = arith.constant 0 : index
    %45 = vector.load %arg6[%c40, %c0_28] : memref<72x256xf32, #tpu.memory_space<vmem>>, vector<8x256xf32>
    tpu.vector_store %arg6[%c40, %c0_28], %44 {strides = array<i32>} : memref<72x256xf32, #tpu.memory_space<vmem>>, vector<8x256xf32>,
    %c0_29 = arith.constant 0 : index
    %c32_30 = arith.constant 32 : index
    %46 = vector.load %arg5[%c0_29, %c32_30] : memref<8x290xf32, #tpu.memory_space<vmem>>, vector<8x256xf32>
    %cst_31 = arith.constant 0.000000e+00 : f32
    %47 = vector.broadcast %cst_31 : f32 to vector<8x256xf32>
    %48 = arith.select %23, %46, %47 : vector<8x256xi1>, vector<8x256xf32>
    %c48 = arith.constant 48 : index
    %c0_32 = arith.constant 0 : index
    %49 = vector.load %arg6[%c48, %c0_32] : memref<72x256xf32, #tpu.memory_space<vmem>>, vector<8x256xf32>
    tpu.vector_store %arg6[%c48, %c0_32], %48 {strides = array<i32>} : memref<72x256xf32, #tpu.memory_space<vmem>>, vector<8x256xf32>,
    %c0_33 = arith.constant 0 : index
    %c33 = arith.constant 33 : index
    %50 = vector.load %arg5[%c0_33, %c33] : memref<8x290xf32, #tpu.memory_space<vmem>>, vector<8x256xf32>
    %c56 = arith.constant 56 : index
    %c0_34 = arith.constant 0 : index
    %51 = vector.load %arg6[%c56, %c0_34] : memref<72x256xf32, #tpu.memory_space<vmem>>, vector<8x256xf32>
    tpu.vector_store %arg6[%c56, %c0_34], %50 {strides = array<i32>} : memref<72x256xf32, #tpu.memory_space<vmem>>, vector<8x256xf32>,
    %c0_35 = arith.constant 0 : index
    %c34 = arith.constant 34 : index
    %52 = vector.load %arg5[%c0_35, %c34] : memref<8x290xf32, #tpu.memory_space<vmem>>, vector<8x256xf32>
    %cst_36 = arith.constant 0.000000e+00 : f32
    %53 = vector.broadcast %cst_36 : f32 to vector<8x256xf32>
    %54 = arith.select %25, %52, %53 : vector<8x256xi1>, vector<8x256xf32>
    %c64 = arith.constant 64 : index
    %c0_37 = arith.constant 0 : index
    %55 = vector.load %arg6[%c64, %c0_37] : memref<72x256xf32, #tpu.memory_space<vmem>>, vector<8x256xf32>
    tpu.vector_store %arg6[%c64, %c0_37], %54 {strides = array<i32>} : memref<72x256xf32, #tpu.memory_space<vmem>>, vector<8x256xf32>,
    %c0_38 = arith.constant 0 : index
    %c0_39 = arith.constant 0 : index
    %56 = vector.load %arg2[%c0_38, %c0_39] : memref<8x72xf32, #tpu.memory_space<vmem>>, vector<8x72xf32>
    %c0_40 = arith.constant 0 : index
    %c0_41 = arith.constant 0 : index
    %57 = vector.load %arg6[%c0_40, %c0_41] : memref<72x256xf32, #tpu.memory_space<vmem>>, vector<72x256xf32>
    %cst_42 = arith.constant dense<0.000000e+00> : vector<8x256xf32>
    %58 = tpu.matmul %56, %57, %cst_42 {dimension_numbers = #tpu.dot_dimension_numbers<[1], [0], [0], [1], [0, 0, 1, 1], [], []>} : vector<8x72xf32>, vector<72x256xf32>, vector<8x256xf32> -> vector<8x256xf32>
    %c0_43 = arith.constant 0 : index
    %c0_44 = arith.constant 0 : index
    %59 = vector.load %arg3[%c0_43, %c0_44] : memref<8x1xf32, #tpu.memory_space<vmem>>, vector<8x1xf32>
    %60 = vector.broadcast %59 : vector<8x1xf32> to vector<8x256xf32>
    %61 = arith.addf %58, %60 : vector<8x256xf32>
    %cst_45 = arith.constant 0.000000e+00 : f32
    %62 = vector.broadcast %cst_45 : f32 to vector<8x256xf32>
    %63 = arith.maximumf %61, %62 : vector<8x256xf32>
    %64 = vector.shape_cast %63 : vector<8x256xf32> to vector<1x8x256xf32>
    %c0_46 = arith.constant 0 : index
    %c0_47 = arith.constant 0 : index
    %c0_48 = arith.constant 0 : index
    %65 = vector.load %arg4[%c0_46, %c0_47, %c0_48] : memref<1x8x256xf32, #tpu.memory_space<vmem>>, vector<1x8x256xf32>
    tpu.vector_store %arg4[%c0_46, %c0_47, %c0_48], %64 {strides = array<i32>} : memref<1x8x256xf32, #tpu.memory_space<vmem>>, vector<1x8x256xf32>,
    return
  }
  func.func @transform_0(%arg0: i32) -> (i32, i32, i32) {
    %c0_i32 = arith.constant 0 : i32
    %c0_i32_0 = arith.constant 0 : i32
    %c0_i32_1 = arith.constant 0 : i32
    return %arg0, %c0_i32, %c0_i32_0 : i32, i32, i32
  }
  func.func @transform_1(%arg0: i32) -> (i32, i32) {
    %c0_i32 = arith.constant 0 : i32
    %c0_i32_0 = arith.constant 0 : i32
    %c0_i32_1 = arith.constant 0 : i32
    return %c0_i32, %c0_i32_0 : i32, i32
  }
  func.func @transform_2(%arg0: i32) -> (i32, i32) {
    %c0_i32 = arith.constant 0 : i32
    %c0_i32_0 = arith.constant 0 : i32
    %c0_i32_1 = arith.constant 0 : i32
    return %c0_i32, %c0_i32_0 : i32, i32
  }
  func.func @transform_3(%arg0: i32) -> (i32, i32, i32) {
    %c0_i32 = arith.constant 0 : i32
    %c0_i32_0 = arith.constant 0 : i32
    %c0_i32_1 = arith.constant 0 : i32
    return %arg0, %c0_i32, %c0_i32_0 : i32, i32, i32
  }
}

</mosaic_0001>

<bundles_post_ra>
// kernel: decoder_forward.2
= control target key start
LH: loop header
LB: loop body
LE: loop exit
PB: predicated region body
PF: predicated region fallthrough
CT: control target
= control target key end

     0   :  { %s413_s12 = smov 0   ;;  %s473_s0 = inlined_call_operand.vmem [shape: f32[2,4,64], index: 0, kind: input, shape index: {}]   ;;  %s474_s1 = inlined_call_operand.vmem [shape: f32[4,36], index: 1, kind: input, shape index: {}]   ;;  %s475_s2 = inlined_call_operand.vmem [shape: f32[4,1], index: 2, kind: input, shape index: {}]   ;;  %s476_s3 = inlined_call_operand.vmem [shape: f32[2,4,64], index: 3, kind: output, shape index: {}]  }
   0x1 LB: > { %s343_s13 = sadd.s32 4294967295, %s380_s12   ;;  %p347_p0 = scmp.ge.s32.totalorder %s380_s12, 1  ;;  %s380_s12 = sphi %s413_s12, %s13_s12  }
   0x2   : > { %p136_p1 = scmp.lt.s32.totalorder %s380_s12, 3 }
   0x4   : > { %p137_p2 = pnand %p347_p0, %p136_p1 }
   0x5   : > { %p158_p3 = scmp.lt.s32.totalorder (!%p137_p2), %s343_s13, 1  ;;  %s383_s18 = smov (!%p137_p2), 9  }
   0x6   : > { %140 = sbr.rel (%p137_p2) target bundleno = 413 (0x19d), region = 32  ;;  %s384_s19 = smov (!%p137_p2), 110  }
   0x7   : > { %s385_s20 = smov (!%p137_p2), 112   ;;  %s386_s21 = smov (!%p137_p2), 118  }
   0x8   : > { %s387_s22 = smov (!%p137_p2), 111   ;;  %s388_s23 = smov (!%p137_p2), 126  }
   0x9   : > { %s389_s24 = smov (!%p137_p2), 119   ;;  %s390_s25 = smov (!%p137_p2), 120  }
   0xa   : > { %s391_s26 = smov (!%p137_p2), 127  }
   0xb   : > { %vm166_vm0 = vcmask 666624   ;;  %v382_v0 = vmov 0.0   ;;  %s482_s13 = smov (!%p158_p3, %s343_s13), 1  ;;  %v175_v2 = vlaneseq  ;;  %vm173_vm1 = vcmask 592968   ;;  %v254_v22 = vld [vmem:[%s475_s2] sm:$0xf] }
   0xc   : > { %167 = vst.msk [vmem:[#allocation2] sm:$0xf] %vm166_vm0, %v382_v0  ;;  %s348_s14 = sshll.u32 %s482_s13, 2  ;;  %vm193_vm3 = vcmask 519168   ;;  %v392_v23 = vmov 0   ;;  %vm264_vm5 = vcmask 1043456  }
   0xd   : > { %s161_s17 = scalar_lea.vmem %s473_s0, %s348_s14  ;;  %v176_v3 = vand.u32 127, %v175_v2  ;;  %373 = vset.pattern.permute.xlu0 %v392_v23  ;;  %v248_v37 = vld [vmem:[%s474_s1] sm:$0xf]  ;;  %vm260_vm6 = vcmask 293888   ;;  %s165_s6 = scalar_lea.vmem %s476_s3, %s348_s14 }
   0xe   : > { %v168_v1 = vld [vmem:[%s161_s17] sm:$0xf] }
   0xf   : > { %170 = vrot.lane.b32.xlu0 %v168_v1, %s383_s18  ;;  %v181_v5 = vand.u32 7, %v176_v3 }
  0x11   : > { %vm429_vm2 = vcmp.gt.s32.totalorder %v181_v5, 0  ;;  %vm436_vm4 = vcmp.lt.s32.totalorder %v181_v5, 7 }
  0x81   : > { %v171_v4 = vpop.permute.xlu0 %170 }
  0x82   : > { %174 = vst.msk [vmem:[#allocation2] sm:$0xf] %vm173_vm1, %v171_v4 }
  0x89   : > { %v241_v7 = vld [vmem:[#allocation2] sm:$0xf] }
  0x8a   : > { %v228_v8 = vld [vmem:[#allocation2] sm:$0xf]  ;;  %243 = vrot.lane.b32.xlu0 %v241_v7, %s384_s19 }
  0x8b   : > { %v221_v9 = vld [vmem:[#allocation2] sm:$0xf]  ;;  %230 = vrot.lane.b32.xlu1 %v228_v8, %s385_s20 }
  0x8c   : > { %223 = vrot.lane.b32.xlu2 %v221_v9, %s386_s21  ;;  %v191_v10 = vld [vmem:[#allocation2] sm:$0xf] }
  0x8d   : > { %v192_v11 = vsel %vm429_vm2, %v191_v10, 0.0  ;;  %v235_v12 = vld [vmem:[#allocation2] sm:$0xf] }
  0x8e   : > { %194 = vst.msk [vmem:[#allocation3] sm:$0xf] %vm193_vm3, %v192_v11  ;;  %v201_v13 = vld [vmem:[#allocation2] sm:$0xf] }
  0x8f   : > { %v215_v14 = vld [vmem:[#allocation2] sm:$0xf] }
  0x90   : > { %v208_v15 = vld [vmem:[#allocation2] sm:$0xf] }
  0x91   : > { %v195_v16 = vld [vmem:[#allocation2] sm:$0xf] }
  0x92   : > { %203 = vrot.lane.b32.xlu0 %v201_v13, %s388_s23 }
  0x93   : > { %237 = vrot.lane.b32.xlu1 %v235_v12, %s387_s22 }
  0x94   : > { %217 = vrot.lane.b32.xlu2 %v215_v14, %s389_s24 }
  0x9a   : > { %257 = vperm.xlu0 %373, %v254_v22  }
  0x9b   : > { %210 = vrot.lane.b32.xlu1 %v208_v15, %s390_s25 }
  0x9c   : > { %197 = vrot.lane.b32.xlu2 %v195_v16, %s391_s26 }
  0xe6   : > { %v224_v18 = vpop.permute.xlu2 %223 }
  0xe7   : > { %v226_v19 = vsel %vm436_vm4, %v224_v18, 0.0 }
  0xe8   : > { %227 = vst.msk [vmem:[#allocation3 + $0x14] sm:$0xf] %vm193_vm3, %v226_v19 }
  0xee   : > { %v218_v20 = vpop.permute.xlu2 %217 }
  0xef   : > { %220 = vst.msk [vmem:[#allocation3 + $0x10] sm:$0xf] %vm193_vm3, %v218_v20 }
  0xf6   : > { %v198_v21 = vpop.permute.xlu2 %197  ;;  %v251_v35 = vld [vmem:[#allocation3 + $0x10] sm:$0xff] }
  0xf7   : > { %200 = vst.msk [vmem:[#allocation3 + $0x4] sm:$0xf] %vm193_vm3, %v198_v21 }
  0xfc   : > { %v244_v24 = vpop.permute.xlu0 %243 }
  0xfd   : > { %v231_v25 = vpop.permute.xlu1 %230  ;;  %v246_v26 = vsel %vm436_vm4, %v244_v24, 0.0 }
  0xfe   : > { %v233_v27 = vsel %vm429_vm2, %v231_v25, 0.0  ;;  %247 = vst.msk [vmem:[#allocation3 + $0x20] sm:$0xf] %vm193_vm3, %v246_v26  ;;  %v249_v38 = vld [vmem:[#allocation3] sm:$0xff] }
  0xff   : > { %234 = vst.msk [vmem:[#allocation3 + $0x18] sm:$0xf] %vm193_vm3, %v233_v27 }
 0x104   : > { %v204_v29 = vpop.permute.xlu0 %203 }
 0x105   : > { %v238_v28 = vpop.permute.xlu1 %237  ;;  %v206_v30 = vsel %vm436_vm4, %v204_v29, 0.0  ;;  %v253_v31 = vld [vmem:[#allocation3 + $0x20] sm:$0xf] }
 0x106   : > { %240 = vst.msk [vmem:[#allocation3 + $0x1c] sm:$0xf] %vm193_vm3, %v238_v28  ;;  %350 = vmatpush.msk.msra.mxu0 %vm264_vm5, %v253_v31 }
 0x107   : > { %207 = vst.msk [vmem:[#allocation3 + $0x8] sm:$0xf] %vm193_vm3, %v206_v30 }
 0x10c   : > { %v258_v39 = vpop.permute.xlu0 %257 }
 0x10d   : > { %v211_v32 = vpop.permute.xlu1 %210  ;;  %v252_v33 = vld [vmem:[#allocation3 + $0x18] sm:$0xff] }
 0x10e   : > { %v213_v34 = vsel %vm429_vm2, %v211_v32, 0.0  ;;  %280 = vmatpush.msra.mxu0 %v252_v33 }
 0x10f   : > { %214 = vst.msk [vmem:[#allocation3 + $0xc] sm:$0xf] %vm193_vm3, %v213_v34 }
 0x110   : > { %281 = vmatpush.msra.mxu0 %v251_v35 }
 0x116   : > { %v250_v36 = vld [vmem:[#allocation3 + $0x8] sm:$0xff] }
 0x117   : > { %282 = vmatpush.msra.mxu0 %v250_v36 }
 0x119   : > { %283 = vmatpush.msra.mxu0 %v249_v38 }
 0x11a   : > { %351 = vmatmul.msk.f32.vlgmr.msra.gmra.mxu0 %vm260_vm6, %v248_v37 }
 0x197   : > { %v285_v40 = vpop.f32.mrf.mxu0 }
 0x198   : > { %v286_v41 = vadd.f32 %v285_v40, %v258_v39 }
 0x19a   : > { %v288_v42 = vmax.f32 %v286_v41, 0.0 }
 0x19c   : > { %289 = vst.msk [vmem:[%s165_s6] sm:$0xf] %vm193_vm3, %v288_v42 }
 0x19d PF: > { %s13_s12 = sadd.s32 1, %s380_s12  }
 0x19e   : > { %p10_p4 = scmp.ge.s32.totalorder %s13_s12, 4  }
 0x1a0   :  { %12 = sbr.rel (!%p10_p4) target bundleno = 1 (0x1), region = 62 }

// kernel: decoder_forward.3
= control target key start
LH: loop header
LB: loop body
LE: loop exit
PB: predicated region body
PF: predicated region fallthrough
CT: control target
= control target key end

     0   :  { %s621_s12 = smov 0   ;;  %s709_s0 = inlined_call_operand.vmem [shape: f32[2,8,256], index: 0, kind: input, shape index: {}]   ;;  %s710_s1 = inlined_call_operand.vmem [shape: f32[8,72], index: 1, kind: input, shape index: {}]   ;;  %s711_s2 = inlined_call_operand.vmem [shape: f32[8,1], index: 2, kind: input, shape index: {}]   ;;  %s712_s3 = inlined_call_operand.vmem [shape: f32[2,8,256], index: 3, kind: output, shape index: {}]  }
   0x1 LB: > { %s519_s13 = sadd.s32 4294967295, %s588_s12   ;;  %p523_p0 = scmp.ge.s32.totalorder %s588_s12, 1  ;;  %s588_s12 = sphi %s621_s12, %s13_s12  }
   0x2   : > { %p137_p1 = scmp.lt.s32.totalorder %s588_s12, 3 }
   0x4   : > { %p138_p2 = pnand %p523_p0, %p137_p1 }
   0x5   : > { %p161_p3 = scmp.lt.s32.totalorder (!%p138_p2), %s519_s13, 1  ;;  %s591_s18 = smov (!%p138_p2), 17  }
   0x6   : > { %141 = sbr.rel (%p138_p2) target bundleno = 444 (0x1bc), region = 32  ;;  %s592_s19 = smov (!%p138_p2), 94  }
   0x7   : > { %s593_s20 = smov (!%p138_p2), 96   ;;  %s594_s21 = smov (!%p138_p2), 95  }
   0x8   : > { %s595_s22 = smov (!%p138_p2), 110   ;;  %s596_s23 = smov (!%p138_p2), 111  }
   0x9   : > { %s597_s24 = smov (!%p138_p2), 112   ;;  %s598_s25 = smov (!%p138_p2), 126  }
   0xa   : > { %s599_s26 = smov (!%p138_p2), 127  }
   0xb   : > { %v590_v0 = vmov 0.0   ;;  %s722_s13 = smov (!%p161_p3, %s519_s13), 1  ;;  %vm173_vm0 = vcmask 277504   ;;  %vm188_vm1 = vcmask 1047688   ;;  %vm183_vm2 = vcmask 138240   ;;  %v410_v39 = vld [vmem:[%s711_s2] sm:$0xff] }
   0xc   : > { %171 = vst [vmem:[#allocation2] sm:$0xff] %v590_v0  ;;  %s532_s14 = sshll.u32 %s722_s13, 4  ;;  %v192_v13 = vlaneseq  ;;  %vm382_vm3 = vcmask 769024   ;;  %vm363_vm6 = vcmask 777216   ;;  %vm342_vm7 = vcmask 785408   ;;  %v391_v61 = vld [vmem:[%s710_s1] sm:$0xff] }
   0xd   : > { %s165_s17 = scalar_lea.vmem %s709_s0, %s532_s14  ;;  %174 = vst.msk [vmem:[#allocation2 + $0x10] sm:$0xff] %vm173_vm0, %v590_v0  ;;  %vm321_vm10 = vcmask 900096   ;;  %v600_v42 = vmov 0   ;;  %vm302_vm11 = vcmask 908288   ;;  %vm281_vm12 = vcmask 916480   ;;  %s170_s6 = scalar_lea.vmem %s712_s3, %s532_s14 }
   0xe   : > { %v175_v1 = vld [vmem:[%s165_s17] sm:$0xff]  ;;  %v176_v2 = vld [vmem:[%s165_s17 + $0x8] sm:$0xff]  ;;  %v193_v17 = vand.u32 127, %v192_v13  ;;  %580 = vset.pattern.permute.xlu2 %v600_v42  ;;  %581 = vset.pattern.permute.xlu0 %v600_v42  ;;  %vm260_vm13 = vcmask 1031168   ;;  %vm241_vm14 = vcmask 1039360   ;;  %vm416_vm15 = vcmask 588800  }
   0xf   : > { %179 = vrot.lane.b32.xlu0 %v175_v1, %s591_s18 }
  0x10   : > { %v194_v18 = vadd.s32 128, %v193_v17  ;;  %v199_v22 = vand.u32 15, %v193_v17 }
  0x12   : > { %v206_v23 = vand.u32 15, %v194_v18  ;;  %vm653_vm4 = vcmp.lt.s32.totalorder %v199_v22, 15  ;;  %vm665_vm8 = vcmp.gt.s32.totalorder %v199_v22, 0 }
  0x14   : > { %vm657_vm5 = vcmp.lt.s32.totalorder %v206_v23, 15  ;;  %vm669_vm9 = vcmp.gt.s32.totalorder %v206_v23, 0 }
  0x17   : > { %181 = vrot.lane.b32.xlu0 %v176_v2, %s591_s18 }
  0x81   : > { %v180_v3 = vpop.permute.xlu0 %179 }
  0x82   : > { %189 = vst.msk [vmem:[#allocation2] sm:$0xff] %vm188_vm1, %v180_v3 }
  0x89   : > { %v182_v4 = vpop.permute.xlu0 %181  ;;  %v637_v5 = vld [vmem:[#allocation2] sm:$0xff] }
  0x8a   : > { %v639_v6 = vsel %vm183_vm2, %v180_v3, %v182_v4  ;;  %191 = vst.msk [vmem:[#allocation2 + $0x10] sm:$0xff] %vm183_vm2, %v182_v4  ;;  %376 = vrot.lane.b32.xlu1 %v637_v5, %s592_s19 }
  0x8b   : > { %v565_v8 = vpack.i.bf16 %v639_v6, %v637_v5 }
  0x91   : > { %v372_v7 = vld [vmem:[#allocation2 + $0x10] sm:$0xff] }
  0x92   : > { %336 = vrot.lane.b32.xlu1 %v637_v5, %s593_s20  ;;  %380 = vrot.lane.b32.xlu2 %v372_v7, %s592_s19 }
  0x93   : > { %361 = vrot.lane.b32.xlu0 %v372_v7, %s594_s21 }
  0x9a   : > { %315 = vrot.lane.b32.xlu1 %v637_v5, %s595_s22  ;;  %300 = vrot.lane.b32.xlu2 %v372_v7, %s596_s23 }
  0x9b   : > { %340 = vrot.lane.b32.xlu0 %v372_v7, %s593_s20 }
  0xa2   : > { %279 = vrot.lane.b32.xlu2 %v372_v7, %s597_s24  ;;  %378 = vrot.lane.b32.xlu1 %v639_v6, %s592_s19 }
  0xa3   : > { %319 = vrot.lane.b32.xlu0 %v372_v7, %s595_s22 }
  0xaa   : > { %566 = vrot.lane.b32.xlu2 %v565_v8, %s594_s21  ;;  %571 = vrot.lane.b32.xlu1 %v565_v8, %s596_s23 }
  0xab   : > { %275 = vrot.lane.b32.xlu0 %v637_v5, %s597_s24 }
  0xb2   : > { %338 = vrot.lane.b32.xlu2 %v639_v6, %s593_s20  ;;  %277 = vrot.lane.b32.xlu1 %v639_v6, %s597_s24 }
  0xb3   : > { %254 = vrot.lane.b32.xlu0 %v637_v5, %s598_s25 }
  0xba   : > { %317 = vrot.lane.b32.xlu2 %v639_v6, %s595_s22  ;;  %256 = vrot.lane.b32.xlu1 %v639_v6, %s598_s25 }
  0xbb   : > { %576 = vrot.lane.b32.xlu0 %v565_v8, %s599_s26 }
  0xc2   : > { %258 = vrot.lane.b32.xlu2 %v372_v7, %s598_s25  ;;  %239 = vrot.lane.b32.xlu1 %v372_v7, %s599_s26 }
  0xca   : > { %413 = vperm.xlu2 %580, %v410_v39  }
  0xec   : > { %v381_v9 = vpop.permute.xlu2 %380 }
  0xf4   : > { %v301_v10 = vpop.permute.xlu2 %300 }
  0xfc   : > { %v377_v11 = vpop.permute.xlu1 %376  ;;  %v280_v12 = vpop.permute.xlu2 %279 }
 0x104   : > { %v337_v14 = vpop.permute.xlu1 %336  ;;  %v567_v15 = vpop.permute.xlu2 %566 }
 0x105   : > { %v362_v16 = vpop.permute.xlu0 %361  ;;  %v569_v24 = vunpack.i.h.bf16 %v567_v15  ;;  %v568_v25 = vunpack.i.l.bf16 %v567_v15 }
 0x107   : > { %v364_v32 = vsel %vm363_vm6, %v568_v25, %v569_v24  ;;  %v365_v33 = vsel %vm363_vm6, %v569_v24, %v362_v16 }
 0x10c   : > { %v316_v19 = vpop.permute.xlu1 %315  ;;  %v339_v21 = vpop.permute.xlu2 %338 }
 0x10d   : > { %v341_v20 = vpop.permute.xlu0 %340  ;;  %v343_v37 = vsel %vm342_vm7, %v337_v14, %v339_v21 }
 0x10e   : > { %v344_v38 = vsel %vm342_vm7, %v339_v21, %v341_v20 }
 0x114   : > { %v379_v28 = vpop.permute.xlu1 %378  ;;  %v318_v36 = vpop.permute.xlu2 %317 }
 0x115   : > { %v320_v29 = vpop.permute.xlu0 %319  ;;  %v383_v30 = vsel %vm382_vm3, %v377_v11, %v379_v28  ;;  %v384_v31 = vsel %vm382_vm3, %v379_v28, %v381_v9  ;;  %v322_v40 = vsel %vm321_vm10, %v316_v19, %v318_v36 }
 0x116   : > { %534 = vmatpush.msk.msra.mxu0 %vm653_vm4, %v383_v30  ;;  %540 = vmatpush.msk.msra.mxu1 %vm657_vm5, %v384_v31  ;;  %v323_v41 = vsel %vm321_vm10, %v318_v36, %v320_v29 }
 0x118   : > { %428 = vmatpush.msra.mxu0 %v364_v32  ;;  %448 = vmatpush.msra.mxu1 %v365_v33 }
 0x11a   : > { %535 = vmatpush.msk.msra.mxu0 %vm665_vm8, %v343_v37  ;;  %541 = vmatpush.msk.msra.mxu1 %vm669_vm9, %v344_v38 }
 0x11c   : > { %536 = vmatpush.msk.msra.mxu0 %vm653_vm4, %v322_v40  ;;  %542 = vmatpush.msk.msra.mxu1 %vm657_vm5, %v323_v41  ;;  %v572_v43 = vpop.permute.xlu1 %571  ;;  %v259_v53 = vpop.permute.xlu2 %258 }
 0x11d   : > { %v276_v44 = vpop.permute.xlu0 %275  ;;  %v574_v45 = vunpack.i.h.bf16 %v572_v43  ;;  %v573_v46 = vunpack.i.l.bf16 %v572_v43 }
 0x11f   : > { %v303_v47 = vsel %vm302_vm11, %v573_v46, %v574_v45  ;;  %v304_v48 = vsel %vm302_vm11, %v574_v45, %v301_v10 }
 0x120   : > { %431 = vmatpush.msra.mxu0 %v303_v47  ;;  %451 = vmatpush.msra.mxu1 %v304_v48 }
 0x124   : > { %v278_v49 = vpop.permute.xlu1 %277  ;;  %v414_v0 = vpop.permute.xlu2 %413 }
 0x125   : > { %v255_v50 = vpop.permute.xlu0 %254  ;;  %v282_v51 = vsel %vm281_vm12, %v276_v44, %v278_v49  ;;  %v283_v52 = vsel %vm281_vm12, %v278_v49, %v280_v12 }
 0x126   : > { %537 = vmatpush.msk.msra.mxu0 %vm665_vm8, %v282_v51  ;;  %543 = vmatpush.msk.msra.mxu1 %vm669_vm9, %v283_v52 }
 0x12c   : > { %v257_v54 = vpop.permute.xlu1 %256 }
 0x12d   : > { %v577_v55 = vpop.permute.xlu0 %576  ;;  %v261_v56 = vsel %vm260_vm13, %v255_v50, %v257_v54  ;;  %v262_v57 = vsel %vm260_vm13, %v257_v54, %v259_v53 }
 0x12e   : > { %v579_v58 = vunpack.i.h.bf16 %v577_v55  ;;  %v578_v59 = vunpack.i.l.bf16 %v577_v55  ;;  %538 = vmatpush.msk.msra.mxu0 %vm653_vm4, %v261_v56  ;;  %544 = vmatpush.msk.msra.mxu1 %vm657_vm5, %v262_v57 }
 0x130   : > { %v242_v60 = vsel %vm241_vm14, %v578_v59, %v579_v58 }
 0x131   : > { %434 = vmatpush.msra.mxu0 %v242_v60 }
 0x133   : > { %539 = vmatpush.msk.msra.mxu0 %vm665_vm8, %v637_v5 }
 0x134   : > { %v240_v62 = vpop.permute.xlu1 %239  ;;  %528 = vmatmul.msk.f32.vlgmr.msra.gmra.mxu0 %vm416_vm15, %v391_v61 }
 0x135   : > { %v243_v63 = vsel %vm241_vm14, %v579_v58, %v240_v62 }
 0x136   : > { %454 = vmatpush.msra.mxu1 %v243_v63 }
 0x138   : > { %545 = vmatpush.msk.msra.mxu1 %vm669_vm9, %v639_v6 }
 0x139   : > { %529 = vmatmul.msk.f32.vlgmr.msra.gmra.mxu1 %vm416_vm15, %v391_v61 }
 0x1b1   : > { %v437_v1 = vpop.f32.mrf.mxu0 }
 0x1b2   : > { %v438_v2 = vadd.f32 %v437_v1, %v414_v0 }
 0x1b4   : > { %v460_v3 = vmax.f32 %v438_v2, 0.0 }
 0x1b6   : > { %462 = vst [vmem:[%s170_s6] sm:$0xff] %v460_v3  ;;  %v457_v4 = vpop.f32.mrf.mxu1 }
 0x1b7   : > { %v458_v5 = vadd.f32 %v457_v4, %v414_v0 }
 0x1b9   : > { %v461_v7 = vmax.f32 %v458_v5, 0.0 }
 0x1bb   : > { %463 = vst [vmem:[%s170_s6 + $0x8] sm:$0xff] %v461_v7 }
 0x1bc PF: > { %s13_s12 = sadd.s32 1, %s588_s12  }
 0x1bd   : > { %p10_p4 = scmp.ge.s32.totalorder %s13_s12, 4  }
 0x1bf   :  { %12 = sbr.rel (!%p10_p4) target bundleno = 1 (0x1), region = 62 }

</bundles_post_ra>
